<compile_context>
chip_gen: v7x
topology: tpu7x:2x2x1
jax: 0.10.0
libtpu: 0.0.40
codegen_flags: <defaults>
</compile_context>

<pallas_src>
import functools
import math

import jax
import jax.numpy as jnp
from jax.experimental import pallas as pl
from jax.experimental.pallas import tpu as pltpu

_INV_SQRT2 = 0.7071067811865476
_MIB = 1024 * 1024
# Single-buffer the i-constant blocks only when it frees meaningful VMEM;
# below this the small per-row-tile stall isn't worth it.
_SINGLE_BUFFER_MIN_SAVINGS = 4 * _MIB


def _gelu(h, approximate):
    if approximate:
        # tanh GELU: transcendental goes through the EUP slot (co-issues with MXU).
        return jax.nn.gelu(h, approximate=True)
    # Exact erf GELU - matches torch.nn.GELU() default (VALU polynomial).
    return 0.5 * h * (1.0 + jax.lax.erf(h * _INV_SQRT2))


def _ffn_kernel_fused(x_ref, w1_ref, b1_ref, w2_ref, b2_ref, o_ref, *, approximate):
    """dff fits in one chunk: no accumulator scratch, no init/finalize phases."""
    h = jnp.dot(x_ref[...], w1_ref[...], preferred_element_type=jnp.float32)
    h = _gelu(h + b1_ref[...].astype(jnp.float32), approximate)
    out = jnp.dot(h.astype(w2_ref.dtype), w2_ref[...],
                  preferred_element_type=jnp.float32)
    o_ref[...] = (out + b2_ref[...].astype(jnp.float32)).astype(o_ref.dtype)


def _ffn_kernel_acc(x_ref, w1_ref, b1_ref, w2_ref, b2_ref, o_ref, acc_ref, *,
                    approximate):
    """dff streamed in chunks along the innermost ("arbitrary") grid axis."""
    j = pl.program_id(1)

    @pl.when(j == 0)
    def _():
        acc_ref[...] = jnp.zeros_like(acc_ref)

    # Native-dtype MXU feeds (bf16 goes straight in), f32 accumulation.
    h = jnp.dot(x_ref[...], w1_ref[...], preferred_element_type=jnp.float32)
    h = _gelu(h + b1_ref[...].astype(jnp.float32), approximate)
    acc_ref[...] += jnp.dot(h.astype(w2_ref.dtype), w2_ref[...],
                            preferred_element_type=jnp.float32)

    @pl.when(j == pl.num_programs(1) - 1)
    def _():
        o_ref[...] = (acc_ref[...] + b2_ref[...].astype(jnp.float32)).astype(o_ref.dtype)


def _pick_tile(total, target, aligns=(256, 128, 32, 16, 8)):
    """Largest divisor of `total` <= target, preferring MXU-friendly alignment
    (256, then 128, ...).  Falls back to `total` (a full-extent block always
    satisfies the layout rules)."""
    target = max(1, min(target, total))
    for a in aligns:
        t = (target // a) * a
        while t >= a:
            if total % t == 0:
                return t
            t -= a
    return total


def _vmem_capacity_bytes():
    try:
        cap = getattr(pltpu.get_tpu_info(), "vmem_capacity_bytes", None)
        if cap:
            return int(cap)
    except Exception:
        pass
    try:
        kind = jax.devices()[0].device_kind.lower()
    except Exception:
        kind = ""
    if "v5" in kind or "v6" in kind:
        return 128 * _MIB
    return 64 * _MIB  # conservative: v7x per-TensorCore VMEM


def _is_v7():
    try:
        return "7" in jax.devices()[0].device_kind.lower()
    except Exception:
        return False


def _single_buffer_io(tm, d_model, x_isz, n_chunks):
    # x tile + out tile each drop one buffer when single-buffered.
    return n_chunks > 1 and 2 * tm * d_model * x_isz >= _SINGLE_BUFFER_MIN_SAVINGS


def _vmem_estimate(tm, tdff, d_model, dff, x_isz, w_isz):
    n_chunks = dff // tdff
    io_bufs = 1 if _single_buffer_io(tm, d_model, x_isz, n_chunks) else 2
    return (io_bufs * tm * d_model * x_isz           # x row tile
            + io_bufs * tm * d_model * x_isz         # out row tile
            + 2 * d_model * tdff * w_isz             # W1 chunk (double-buffered)
            + 2 * tdff * d_model * w_isz             # W2 chunk (double-buffered)
            + 2 * (tdff + d_model) * 4               # bias blocks
            + (tm * d_model * 4 if n_chunks > 1 else 0)  # resident f32 accumulator
            + 2 * tm * tdff * 4)                     # hidden / GELU temporaries (f32)


def feed_forward(x, w1, b1, w2, b2, *, tm=None, tdff=None, approximate=False):
    """x: (B, S, D). w1: (D, dff), b1: (dff,), w2: (dff, D), b2: (D,)."""
    B, S, D = x.shape
    dff = w1.shape[1]
    M = B * S
    x2 = x.reshape(M, D)

    x_isz = x.dtype.itemsize
    w_isz = max(w1.dtype.itemsize, w2.dtype.itemsize)

    vmem_cap = _vmem_capacity_bytes()
    # Leave ~15% headroom for Mosaic internal scratch / semaphores / pipeline
    # metadata instead of asking for the full physical VMEM.
    budget = int(0.85 * vmem_cap)
    big_vmem = vmem_cap >= 96 * _MIB          # v5e / v6e (128 MiB) vs v7x (64 MiB)

    # ---- hidden-dim (dff) chunking ------------------------------------------
    tdff_fixed = tdff is not None
    full_w_bytes = D * dff * w1.dtype.itemsize + dff * D * w2.dtype.itemsize
    if tdff is None:
        if 2 * full_w_bytes <= budget // 2:
            # Whole weight set (even double-buffered) uses <= half the budget:
            # keep it resident (constant index maps) so W1/W2 are read from HBM
            # exactly once instead of once per row tile.
            tdff = dff
        else:
            tdff = _pick_tile(dff, 512 if big_vmem else 256, aligns=(256, 128))
    assert dff % tdff == 0

    # ---- row tiling -----------------------------------------------------------
    if tm is None:
        # tm sets the arithmetic intensity of weight streaming (AI ~= tm
        # flops/byte): v6e needs ~680 flops/byte to be MXU-bound, so go big
        # (up to 1024) on 128-MiB chips; v7x only needs ~320 and has 64 MiB,
        # so 256 is enough.
        target_m = 1024 if big_vmem else 256
        if _is_v7() and M >= 512:
            # Two TensorCores on v7x: keep >= 2 row tiles so the "parallel"
            # axis shards across cores.  Single-TC chips (v5e/v6e) keep the
            # full tile for maximum weight reuse.
            target_m = min(target_m, M // 2)
        tm = _pick_tile(M, min(target_m, M))

        # Shrink until the double-buffered working set fits the VMEM budget.
        for _ in range(16):
            if _vmem_estimate(tm, tdff, D, dff, x_isz, w_isz) <= budget:
                break
            if tm > 128:
                new = _pick_tile(M, tm // 2)
                if new < tm:
                    tm = new
                    continue
            if not tdff_fixed and tdff > 128:
                new = _pick_tile(dff, tdff // 2, aligns=(256, 128))
                if 0 < new < tdff:
                    tdff = new
                    continue
            if tm > 8:
                new = _pick_tile(M, tm // 2)
                if new < tm:
                    tm = new
                    continue
            break
    assert M % tm == 0 and dff % tdff == 0
    n_chunks = dff // tdff

    b1_2 = b1.reshape(1, dff)
    b2_2 = b2.reshape(1, D)

    vmem_needed = _vmem_estimate(tm, tdff, D, dff, x_isz, w_isz)
    vmem_limit = min(budget, max(32 * _MIB, int(1.5 * vmem_needed)))
    vmem_limit = max(vmem_limit, int(1.2 * vmem_needed))   # never starve the kernel
    vmem_limit = int(min(vmem_limit, vmem_cap))

    # Advisory cost estimate: weights are re-streamed once per row tile when
    # dff is chunked, read exactly once when fully resident.
    weight_passes = 1 if n_chunks == 1 else (M // tm)
    bytes_accessed = (x2.size * x_isz
                      + weight_passes * (w1.size * w1.dtype.itemsize
                                         + w2.size * w2.dtype.itemsize)
                      + b1.size * b1.dtype.itemsize
                      + b2.size * b2.dtype.itemsize
                      + M * D * x_isz)
    cost = pl.CostEstimate(
        flops=4 * M * D * dff,                            # two matmuls, 2*M*dff*D each
        transcendentals=(M * dff) if approximate else 0,  # exact erf is a VALU polynomial
        bytes_accessed=bytes_accessed)

    if n_chunks == 1:
        # Resident-weight fused path: no accumulator, no phases.
        kernel = functools.partial(_ffn_kernel_fused, approximate=approximate)
        grid = (M // tm,)
        in_specs = [
            pl.BlockSpec((tm, D), lambda i: (i, 0)),       # x row tile
            pl.BlockSpec((D, dff), lambda i: (0, 0)),      # W1 (resident)
            pl.BlockSpec((1, dff), lambda i: (0, 0)),      # b1
            pl.BlockSpec((dff, D), lambda i: (0, 0)),      # W2 (resident)
            pl.BlockSpec((1, D), lambda i: (0, 0)),        # b2
        ]
        out_specs = pl.BlockSpec((tm, D), lambda i: (i, 0))
        scratch_shapes = []
        dims = ("parallel",)
    else:
        # Blocks whose index only changes on the outer row-tile axis (x, b2,
        # out) are single-buffered when that frees meaningful VMEM; W1/W2
        # change every step and keep default double buffering.
        if _single_buffer_io(tm, D, x_isz, n_chunks):
            def _io_spec(shape, index_map):
                return pl.BlockSpec(shape, index_map, pipeline_mode=pl.Buffered(1))
        else:
            def _io_spec(shape, index_map):
                return pl.BlockSpec(shape, index_map)

        kernel = functools.partial(_ffn_kernel_acc, approximate=approximate)
        grid = (M // tm, n_chunks)
        in_specs = [
            _io_spec((tm, D), lambda i, j: (i, 0)),            # x row tile
            pl.BlockSpec((D, tdff), lambda i, j: (0, j)),      # W1 dff chunk
            pl.BlockSpec((1, tdff), lambda i, j: (0, j)),      # b1 chunk
            pl.BlockSpec((tdff, D), lambda i, j: (j, 0)),      # W2 dff chunk
            _io_spec((1, D), lambda i, j: (0, 0)),             # b2
        ]
        out_specs = _io_spec((tm, D), lambda i, j: (i, 0))
        scratch_shapes = [pltpu.VMEM((tm, D), jnp.float32)]    # resident f32 acc
        dims = ("parallel", "arbitrary")

    out2 = pl.pallas_call(
        kernel,
        out_shape=jax.ShapeDtypeStruct((M, D), x.dtype),
        grid_spec=pltpu.PrefetchScalarGridSpec(
            num_scalar_prefetch=0,
            grid=grid,
            in_specs=in_specs,
            out_specs=out_specs,
            scratch_shapes=scratch_shapes),
        compiler_params=pltpu.CompilerParams(
            dimension_semantics=dims,
            vmem_limit_bytes=vmem_limit),
        cost_estimate=cost,
    )(x2, w1, b1_2, w2, b2_2)

    return out2.reshape(B, S, D)


def init_params(key, d_model, dtype=jnp.float32):
    """Deterministic init mimicking torch.nn.Linear defaults (uniform +-1/sqrt(fan_in))."""
    dff = 4 * d_model
    k1, k2, k3, k4 = jax.random.split(key, 4)
    bound1 = 1.0 / math.sqrt(d_model)
    bound2 = 1.0 / math.sqrt(dff)
    # stored pre-transposed: W1 (d_model, dff), W2 (dff, d_model)
    w1 = jax.random.uniform(k1, (d_model, dff), dtype, -bound1, bound1)
    b1 = jax.random.uniform(k2, (dff,), dtype, -bound1, bound1)
    w2 = jax.random.uniform(k3, (dff, d_model), dtype, -bound2, bound2)
    b2 = jax.random.uniform(k4, (d_model,), dtype, -bound2, bound2)
    return w1, b1, w2, b2


if __name__ == "__main__":
    key = jax.random.PRNGKey(0)
    kx, kp, kx2, kp2 = jax.random.split(key, 4)

    def reference(x, w1, b1, w2, b2):
        h = x.reshape(-1, x.shape[-1]) @ w1 + b1
        h = 0.5 * h * (1.0 + jax.lax.erf(h * _INV_SQRT2))
        return (h @ w2 + b2).reshape(x.shape)

    # 1) Small shapes -> resident-weight fused path (single dff chunk).
    B, S, d_model = 2, 8, 32                   # dff = 128, M = 16
    x = jax.random.normal(kx, (B, S, d_model), dtype=jnp.float32)
    w1, b1, w2, b2 = init_params(kp, d_model)
    out = jax.block_until_ready(feed_forward(x, w1, b1, w2, b2))
    ref = reference(x, w1, b1, w2, b2)
    assert jnp.allclose(out, ref, atol=1e-4, rtol=1e-4), "f32 fused-path mismatch"

    # 2) bf16 operands: native bf16 MXU feeds with f32 accumulation.
    out_bf16 = jax.block_until_ready(
        feed_forward(x.astype(jnp.bfloat16),
                     w1.astype(jnp.bfloat16), b1.astype(jnp.bfloat16),
                     w2.astype(jnp.bfloat16), b2.astype(jnp.bfloat16)))
    assert jnp.allclose(out_bf16.astype(jnp.float32), ref, atol=5e-2, rtol=5e-2), \
        "bf16 mismatch vs reference"

    # 3) Force the chunked-dff accumulator path (grid = (2, 4)) at small shapes.
    B2, S2, d2 = 2, 32, 128                    # dff = 512, M = 64
    x_c = jax.random.normal(kx2, (B2, S2, d2), dtype=jnp.float32)
    w1_c, b1_c, w2_c, b2_c = init_params(kp2, d2)
    out_c = jax.block_until_ready(
        feed_forward(x_c, w1_c, b1_c, w2_c, b2_c, tm=32, tdff=128))
    ref_c = reference(x_c, w1_c, b1_c, w2_c, b2_c)
    assert jnp.allclose(out_c, ref_c, atol=1e-3, rtol=1e-3), "accumulator-path mismatch"

    print("KERNEL_OK")
</pallas_src>

<mosaic_0001>
module attributes {stable_mosaic.version = 11 : i64} {
  func.func @_ffn_kernel_fused(%arg0: i32, %arg1: memref<16x32xf32, #tpu.memory_space<vmem>>, %arg2: memref<32x128xf32, #tpu.memory_space<vmem>>, %arg3: memref<1x128xf32, #tpu.memory_space<vmem>>, %arg4: memref<128x32xf32, #tpu.memory_space<vmem>>, %arg5: memref<1x32xf32, #tpu.memory_space<vmem>>, %arg6: memref<16x32xf32, #tpu.memory_space<vmem>>) attributes {dimension_semantics = [#tpu.dimension_semantics<parallel>], iteration_bounds = array<i64: 1>, scalar_prefetch = 0 : i64, scratch_operands = 0 : i64, tpu.core_type = #tpu.core_type<tc>, window_params = [{transform_indices = @transform_0, window_bounds = array<i64: 16, 32>}, {pipeline_mode = #tpu.pipeline_mode<synchronous>, transform_indices = @transform_1, window_bounds = array<i64: 32, 128>}, {pipeline_mode = #tpu.pipeline_mode<synchronous>, transform_indices = @transform_2, window_bounds = array<i64: 1, 128>}, {pipeline_mode = #tpu.pipeline_mode<synchronous>, transform_indices = @transform_3, window_bounds = array<i64: 128, 32>}, {pipeline_mode = #tpu.pipeline_mode<synchronous>, transform_indices = @transform_4, window_bounds = array<i64: 1, 32>}, {transform_indices = @transform_5, window_bounds = array<i64: 16, 32>}]} {
    %c0 = arith.constant 0 : index
    %c0_0 = arith.constant 0 : index
    %0 = vector.load %arg1[%c0, %c0_0] : memref<16x32xf32, #tpu.memory_space<vmem>>, vector<16x32xf32>
    %c0_1 = arith.constant 0 : index
    %c0_2 = arith.constant 0 : index
    %1 = vector.load %arg2[%c0_1, %c0_2] : memref<32x128xf32, #tpu.memory_space<vmem>>, vector<32x128xf32>
    %cst = arith.constant dense<0.000000e+00> : vector<16x128xf32>
    %2 = tpu.matmul %0, %1, %cst {dimension_numbers = #tpu.dot_dimension_numbers<[1], [0], [0], [1], [0, 0, 1, 1], [], []>} : vector<16x32xf32>, vector<32x128xf32>, vector<16x128xf32> -> vector<16x128xf32>
    %c0_3 = arith.constant 0 : index
    %c0_4 = arith.constant 0 : index
    %3 = vector.load %arg3[%c0_3, %c0_4] : memref<1x128xf32, #tpu.memory_space<vmem>>, vector<1x128xf32>
    %4 = vector.broadcast %3 : vector<1x128xf32> to vector<16x128xf32>
    %5 = arith.addf %2, %4 : vector<16x128xf32>
    %cst_5 = arith.constant 5.000000e-01 : f32
    %6 = vector.broadcast %cst_5 : f32 to vector<16x128xf32>
    %7 = arith.mulf %6, %5 : vector<16x128xf32>
    %cst_6 = arith.constant 0.707106769 : f32
    %8 = vector.broadcast %cst_6 : f32 to vector<16x128xf32>
    %9 = arith.mulf %5, %8 : vector<16x128xf32>
    %10 = math.erf %9 : vector<16x128xf32>
    %cst_7 = arith.constant 1.000000e+00 : f32
    %11 = vector.broadcast %cst_7 : f32 to vector<16x128xf32>
    %12 = arith.addf %11, %10 : vector<16x128xf32>
    %13 = arith.mulf %7, %12 : vector<16x128xf32>
    %c0_8 = arith.constant 0 : index
    %c0_9 = arith.constant 0 : index
    %14 = vector.load %arg4[%c0_8, %c0_9] : memref<128x32xf32, #tpu.memory_space<vmem>>, vector<128x32xf32>
    %cst_10 = arith.constant dense<0.000000e+00> : vector<16x32xf32>
    %15 = tpu.matmul %13, %14, %cst_10 {dimension_numbers = #tpu.dot_dimension_numbers<[1], [0], [0], [1], [0, 0, 1, 1], [], []>} : vector<16x128xf32>, vector<128x32xf32>, vector<16x32xf32> -> vector<16x32xf32>
    %c0_11 = arith.constant 0 : index
    %c0_12 = arith.constant 0 : index
    %16 = vector.load %arg5[%c0_11, %c0_12] : memref<1x32xf32, #tpu.memory_space<vmem>>, vector<1x32xf32>
    %17 = vector.broadcast %16 : vector<1x32xf32> to vector<16x32xf32>
    %18 = arith.addf %15, %17 : vector<16x32xf32>
    %c0_13 = arith.constant 0 : index
    %c0_14 = arith.constant 0 : index
    %19 = vector.load %arg6[%c0_13, %c0_14] : memref<16x32xf32, #tpu.memory_space<vmem>>, vector<16x32xf32>
    tpu.vector_store %arg6[%c0_13, %c0_14], %18 {strides = array<i32>} : memref<16x32xf32, #tpu.memory_space<vmem>>, vector<16x32xf32>,
    return
  }
  func.func @transform_0(%arg0: i32) -> (i32, i32) {
    %c0_i32 = arith.constant 0 : i32
    %c0_i32_0 = arith.constant 0 : i32
    return %arg0, %c0_i32 : i32, i32
  }
  func.func @transform_1(%arg0: i32) -> (i32, i32) {
    %c0_i32 = arith.constant 0 : i32
    %c0_i32_0 = arith.constant 0 : i32
    %c0_i32_1 = arith.constant 0 : i32
    return %c0_i32, %c0_i32_0 : i32, i32
  }
  func.func @transform_2(%arg0: i32) -> (i32, i32) {
    %c0_i32 = arith.constant 0 : i32
    %c0_i32_0 = arith.constant 0 : i32
    %c0_i32_1 = arith.constant 0 : i32
    return %c0_i32, %c0_i32_0 : i32, i32
  }
  func.func @transform_3(%arg0: i32) -> (i32, i32) {
    %c0_i32 = arith.constant 0 : i32
    %c0_i32_0 = arith.constant 0 : i32
    %c0_i32_1 = arith.constant 0 : i32
    return %c0_i32, %c0_i32_0 : i32, i32
  }
  func.func @transform_4(%arg0: i32) -> (i32, i32) {
    %c0_i32 = arith.constant 0 : i32
    %c0_i32_0 = arith.constant 0 : i32
    %c0_i32_1 = arith.constant 0 : i32
    return %c0_i32, %c0_i32_0 : i32, i32
  }
  func.func @transform_5(%arg0: i32) -> (i32, i32) {
    %c0_i32 = arith.constant 0 : i32
    %c0_i32_0 = arith.constant 0 : i32
    return %arg0, %c0_i32 : i32, i32
  }
}

</mosaic_0001>

<bundles_post_ra>
// kernel: tpu_custom_call.1
= control target key start
LH: loop header
LB: loop body
LE: loop exit
PB: predicated region body
PF: predicated region fallthrough
CT: control target
= control target key end

     0   :  { %vm34_vm0 = vcmask 261120   ;;  %s508_s0 = inlined_call_operand.vmem [shape: f32[16,32], index: 0, kind: input, shape index: {}]   ;;  %s509_s1 = inlined_call_operand.vmem [shape: f32[32,128], index: 1, kind: input, shape index: {}]   ;;  %s510_s2 = inlined_call_operand.vmem [shape: f32[1,128], index: 2, kind: input, shape index: {}]   ;;  %s511_s3 = inlined_call_operand.vmem [shape: f32[128,32], index: 3, kind: input, shape index: {}]   ;;  %s512_s4 = inlined_call_operand.vmem [shape: f32[1,32], index: 4, kind: input, shape index: {}]   ;;  %s513_s5 = inlined_call_operand.hbm [shape: f32[16,32], index: 5, kind: output, shape index: {}]  }
   0x1   :  { %v23_v0 = vld [vmem:[%s509_s1] sm:$0xff]  ;;  %v24_v1 = vld [vmem:[%s509_s1 + $0x8] sm:$0xff]  ;;  %v25_v2 = vld [vmem:[%s509_s1 + $0x10] sm:$0xff] }
   0x2   :  { %v316_v3 = vpack.c.bf16 %v24_v1, %v23_v0  ;;  %v26_v4 = vld [vmem:[%s509_s1 + $0x18] sm:$0xff]  ;;  %v21_v5 = vld [vmem:[%s508_s0] sm:$0xff]  ;;  %v127_v8 = vld [vmem:[%s511_s3 + $0x8] sm:$0xff] }
   0x3   :  { %v320_v6 = vpack.c.bf16 %v26_v4, %v25_v2  ;;  %278 = vmatprep.mubr.msk.f32.mxu0 %vm34_vm0, %v21_v5  ;;  %v126_v7 = vld [vmem:[%s511_s3] sm:$0xff]  ;;  %v128_v9 = vld [vmem:[%s511_s3 + $0x10] sm:$0xff]  ;;  %v129_v11 = vld [vmem:[%s511_s3 + $0x18] sm:$0xff] }
   0x4   :  { %317 = vmatprep.subr.bf16.mxu0 %v316_v3  ;;  %v324_v10 = vpack.c.bf16 %v127_v8, %v126_v7  ;;  %v328_v12 = vpack.c.bf16 %v129_v11, %v128_v9  ;;  %v130_v13 = vld [vmem:[%s511_s3 + $0x20] sm:$0xff]  ;;  %v131_v14 = vld [vmem:[%s511_s3 + $0x28] sm:$0xff] }
   0x5   :  { %319 = vmatpush3.bf16.msra.mxu0 %v316_v3 }
   0x6   :  { %10 = vsyncpa [#allocation3], 0  ;;  %321 = vmatprep.subr.bf16.mxu0 %v320_v6  ;;  %325 = vmatprep.subr.bf16.mxu1 %v324_v10  ;;  %v332_v15 = vpack.c.bf16 %v131_v14, %v130_v13  ;;  %v22_v16 = vld [vmem:[%s508_s0 + $0x8] sm:$0xff]  ;;  %v132_v17 = vld [vmem:[%s511_s3 + $0x30] sm:$0xff]  ;;  %s387_s11 = smov [#allocation2]  }
   0x7   :  { %327 = vmatpush3.bf16.msra.mxu1 %v324_v10  ;;  %v133_v18 = vld [vmem:[%s511_s3 + $0x38] sm:$0xff]  ;;  %v134_v20 = vld [vmem:[%s511_s3 + $0x40] sm:$0xff]  ;;  %v135_v21 = vld [vmem:[%s511_s3 + $0x48] sm:$0xff]  ;;  %s231_s12 = sshll.u32 %s387_s11, 4  ;;  %s232_s12 = int_to_ptr.vmem [resolvable:$true] %s231_s12 }
   0x8   :  { %329 = vmatprep.subr.bf16.mxu1 %v328_v12  ;;  %v336_v19 = vpack.c.bf16 %v133_v18, %v132_v17  ;;  %v340_v22 = vpack.c.bf16 %v135_v21, %v134_v20  ;;  %v136_v23 = vld [vmem:[%s511_s3 + $0x50] sm:$0xff]  ;;  %v137_v24 = vld [vmem:[%s511_s3 + $0x58] sm:$0xff]  ;;  %v138_v26 = vld [vmem:[%s511_s3 + $0x60] sm:$0xff]  ;;  %s363_s13 = scalar_lea.vmem %s232_s12, 256  ;;  %p368_p1 = scmp.lt.s32.totalorder %s232_s12, %s232_s12 }
   0x9   :  { %323 = vmatpush3.bf16.msra.mxu0 %v320_v6  ;;  %v344_v25 = vpack.c.bf16 %v137_v24, %v136_v23  ;;  %v139_v27 = vld [vmem:[%s511_s3 + $0x68] sm:$0xff]  ;;  %v140_v29 = vld [vmem:[%s511_s3 + $0x70] sm:$0xff]  ;;  %v141_v30 = vld [vmem:[%s511_s3 + $0x78] sm:$0xff]  ;;  %p364_p0 = scmp.ne.s32.totalorder %s232_s12, %s363_s13  ;;  %p369_p2 = scmp.lt.s32.totalorder %s363_s13, %s363_s13 }
   0xa   :  { %v348_v28 = vpack.c.bf16 %v139_v27, %v138_v26  ;;  %v352_v31 = vpack.c.bf16 %v141_v30, %v140_v29  ;;  %v242_v32 = vld [vmem:[%s510_s2] ss:$0 sm:$0xff] }
   0xb   :  { %331 = vmatpush3.bf16.msra.mxu1 %v328_v12  ;;  %v245_v47 = vld [vmem:[%s512_s4] ss:$0 sm:$0xff]  ;;  %p370_p3 = por %p369_p2, %p368_p1 }
   0xc   :  { %279 = vmatmul.mubr.msk.f32.vlgmr.msra.gmra.mrb[0].mxu0 %vm34_vm0, %v22_v16  ;;  %333 = vmatprep.subr.bf16.mxu1 %v332_v15 }
   0xd   :  { %p371_p4 = pnand %p370_p3, %p364_p0 }
   0xf   :  { %335 = vmatpush3.bf16.msra.mxu1 %v332_v15 }
  0x10   :  { %337 = vmatprep.subr.bf16.mxu1 %v336_v19 }
  0x13   :  { %339 = vmatpush3.bf16.msra.mxu1 %v336_v19 }
  0x14   :  { %341 = vmatprep.subr.bf16.mxu1 %v340_v22 }
  0x17   :  { %343 = vmatpush3.bf16.msra.mxu1 %v340_v22 }
  0x18   :  { %345 = vmatprep.subr.bf16.mxu1 %v344_v25 }
  0x1b   :  { %347 = vmatpush3.bf16.msra.mxu1 %v344_v25 }
  0x1c   :  { %349 = vmatprep.subr.bf16.mxu1 %v348_v28 }
  0x1f   :  { %351 = vmatpush3.bf16.msra.mxu1 %v348_v28 }
  0x20   :  { %353 = vmatprep.subr.bf16.mxu1 %v352_v31 }
  0x23   :  { %355 = vmatpush3.bf16.msra.mxu1 %v352_v31 }
  0xdf   :  { %v280_v33 = vpop.f32.mrb[0].mxu0 }
  0xe0   :  { %v113_v34 = vadd.f32 %v280_v33, %v242_v32  ;;  %v107_v35 = vpop.f32.mrb[1].mxu0 }
  0xe1   :  { %v108_v36 = vadd.f32 %v242_v32, %v107_v35 }
  0xe2   :  { %v119_v37 = vmul.f32 0.70710677, %v113_v34  ;;  %v117_v44 = vmul.f32 0.5, %v113_v34 }
  0xe3   :  { %v118_v38 = vmul.f32 0.70710677, %v108_v36  ;;  %v116_v42 = vmul.f32 0.5, %v108_v36 }
  0xe4   :  { %359 = verf.f32 %v119_v37 }
  0xe5   :  { %361 = verf.f32 %v118_v38 }
  0xee   :  { %v360_v39 = vpop.eup %359 }
  0xef   :  { %v362_v40 = vpop.eup %361  ;;  %v123_v41 = vadd.f32 1.0, %v360_v39 }
  0xf0   :  { %v122_v43 = vadd.f32 1.0, %v362_v40 }
  0xf1   :  { %v125_v46 = vmul.f32 %v123_v41, %v117_v44 }
  0xf2   :  { %v124_v45 = vmul.f32 %v122_v43, %v116_v42 }
  0xf4   :  { %313 = vmatprep.mubr.f32.mxu1 %v124_v45 }
  0xf5   :  { %314 = vmatmul.mubr.f32.vlgmr.msra.gmra.mrb[0].mxu1 %v125_v46 }
 0x1c8   :  { %v315_v48 = vpop.f32.mrb[0].mxu1 }
 0x1c9   :  { %v221_v49 = vadd.f32 %v315_v48, %v245_v47  ;;  %v215_v50 = vpop.f32.mrb[1].mxu1 }
 0x1ca   :  { %v216_v51 = vadd.f32 %v245_v47, %v215_v50 }
 0x1cb   :  { %225 = vst.msk [vmem:[#allocation2 + $0x8] sm:$0xff] %vm34_vm0, %v221_v49 }
 0x1cc   :  { %224 = vst.msk [vmem:[#allocation2] sm:$0xff] %vm34_vm0, %v216_v51 }
 0x1cd   :  { %374 = shalt.err (!%p371_p4)
}
 0x1ce   :  { %s375_s15 = scalar_lea.hbm %s513_s5, 256 }
 0x1cf   :  { %p376_p5 = scmp.ne.s32.totalorder %s513_s5, %s375_s15  ;;  %p379_p6 = scmp.lt.u32.totalorder %s375_s15, %s513_s5 }
 0x1d1   :  { %p381_p7 = pnand %p379_p6, %p376_p5 }
 0x1d3   :  { %384 = shalt.err (!%p381_p7)
}
 0x1d4   :  { %s388_s20 = smov 128   ;;  %s389_s21 = smov 8  }
 0x1d5   :  { %237 = dma.vmem_to_hbm [thread:$0]  %s232_s12, 256, %s513_s5, [#allocation3], %s388_s20, %s388_s20, %s389_s21  }
 0x1d6   :  { %385 = dma.done.wait [#allocation3], 256  }
 0x1d7   :  { %386 = vsyncadd [#allocation3], 4294967040 }
 0x1d8   :  { %241 = vsyncpa [#allocation3], 1 }

</bundles_post_ra>
